<compile_context>
chip_gen: v5e
topology: v5e:2x2
jax: 0.10.0
libtpu: 0.0.40
codegen_flags: <defaults>
</compile_context>

<pallas_src>
import functools

import jax
import jax.numpy as jnp
from jax.experimental import pallas as pl
from jax.experimental.pallas import tpu as pltpu


def _hard_neg_loss_kernel(text_tile_ref, vis_tile_ref, text_full_ref,
                          vis_full_ref, out_ref, acc_ref,
                          *, hard_k, batch, tile_rows):
    i = pl.program_id(0)

    @pl.when(i == 0)
    def _():
        acc_ref[0] = jnp.float32(0.0)

    text_t = text_tile_ref[...]   # (tB, D) native dtype (bf16 ok)
    vis_t = vis_tile_ref[...]     # (tB, D)
    text_f = text_full_ref[...]   # (B,  D) resident
    vis_f = vis_full_ref[...]     # (B,  D) resident

    # MXU matmuls: native-dtype operands, f32 accumulation.
    dims = (((1,), (1,)), ((), ()))
    # rows i*tB .. i*tB+tB of sim_matrix        = text_tile @ vis.T   (tB, B)
    sim_t2v = jax.lax.dot_general(text_t, vis_f, dims,
                                  preferred_element_type=jnp.float32)
    # rows i*tB .. i*tB+tB of sim_matrix.T      = vis_tile  @ text.T  (tB, B)
    sim_v2t = jax.lax.dot_general(vis_t, text_f, dims,
                                  preferred_element_type=jnp.float32)

    # Positive logits diag(sim) for this tile via an elementwise reduce
    # (no diagonal gather from the BxB matrix).
    pos = jnp.sum(text_t.astype(jnp.float32) * vis_t.astype(jnp.float32),
                  axis=1, keepdims=True)                       # (tB, 1)

    local_rows = jax.lax.broadcasted_iota(jnp.int32, (tile_rows, batch), 0)
    cols = jax.lax.broadcasted_iota(jnp.int32, (tile_rows, batch), 1)
    diag = cols == (local_rows + i * tile_rows)

    NEG = jnp.float32(-1e30)

    def ce_rows(sim):
        # Exactly like torch: subtract 10000 at the diagonal before top-k.
        work = jnp.where(diag, sim - 10000.0, sim)
        # Online logsumexp over [pos, top-k hard negatives], unrolled over k.
        m = pos                               # running max     (tB, 1)
        s = jnp.ones_like(pos)                # running sum of exp(x - m)
        for _ in range(hard_k):
            v = jnp.max(work, axis=1, keepdims=True)           # (tB, 1)
            # knock out the first occurrence of this max in each row
            is_max = work == v
            first = jnp.min(jnp.where(is_max, cols, batch),
                            axis=1, keepdims=True)
            work = jnp.where(cols == first, NEG, work)
            m_new = jnp.maximum(m, v)
            s = s * jnp.exp(m - m_new) + jnp.exp(v - m_new)
            m = m_new
        lse = m + jnp.log(s)                                   # (tB, 1)
        return jnp.sum(lse - pos)

    partial = ce_rows(sim_t2v) + ce_rows(sim_v2t)
    acc_ref[0] = acc_ref[0] + partial

    @pl.when(i == pl.num_programs(0) - 1)
    def _():
        out_ref[0] = acc_ref[0] / jnp.float32(batch)


def hard_neg_loss(vis_feat, text_feat, hard_negative_num, *, tile_rows=None):
    """Pallas implementation of HardNegLoss.forward."""
    B, D = text_feat.shape
    assert vis_feat.shape == (B, D)
    k = int(hard_negative_num)
    assert 0 < k <= B

    if tile_rows is None:
        tile_rows = next((c for c in (256, 128, 64, 32, 16) if B % c == 0), B)
    assert B % tile_rows == 0
    num_tiles = B // tile_rows

    kernel = functools.partial(_hard_neg_loss_kernel,
                               hard_k=k, batch=B, tile_rows=tile_rows)

    grid_spec = pltpu.PrefetchScalarGridSpec(
        num_scalar_prefetch=0,
        grid=(num_tiles,),
        in_specs=[
            pl.BlockSpec((tile_rows, D), lambda i: (i, 0)),   # text row tile
            pl.BlockSpec((tile_rows, D), lambda i: (i, 0)),   # vis  row tile
            pl.BlockSpec((B, D), lambda i: (0, 0)),           # text resident
            pl.BlockSpec((B, D), lambda i: (0, 0)),           # vis  resident
        ],
        out_specs=pl.BlockSpec(memory_space=pltpu.MemorySpace.SMEM),
        scratch_shapes=[pltpu.SMEM((1,), jnp.float32)],
    )

    itemsize = jnp.dtype(text_feat.dtype).itemsize
    out = pl.pallas_call(
        kernel,
        out_shape=jax.ShapeDtypeStruct((1,), jnp.float32),
        grid_spec=grid_spec,
        compiler_params=pltpu.CompilerParams(
            dimension_semantics=("arbitrary",),
            vmem_limit_bytes=32 * 1024 * 1024,
        ),
        cost_estimate=pl.CostEstimate(
            flops=4 * B * B * D,
            transcendentals=4 * B * (k + 2),
            bytes_accessed=4 * B * D * itemsize + 4,
        ),
    )(text_feat, vis_feat, text_feat, vis_feat)
    return out[0]


def _reference_loss(vis_feat, text_feat, k):
    """Pure-JAX mirror of the PyTorch forward."""
    sim = text_feat.astype(jnp.float32) @ vis_feat.astype(jnp.float32).T
    B = sim.shape[0]
    eye = jnp.eye(B, dtype=jnp.float32)
    hard_t2v = jax.lax.top_k(sim - 10000.0 * eye, k)[0]
    hard_v2t = jax.lax.top_k(sim.T - 10000.0 * eye, k)[0]
    diag = jnp.diagonal(sim).reshape(-1, 1)
    sample_t2v = jnp.concatenate([diag, hard_t2v], axis=1)
    sample_v2t = jnp.concatenate([diag, hard_v2t], axis=1)

    def ce0(logits):
        lse = jax.scipy.special.logsumexp(logits, axis=1)
        return jnp.mean(lse - logits[:, 0])

    return ce0(sample_t2v) + ce0(sample_v2t)


if __name__ == "__main__":
    key = jax.random.PRNGKey(0)
    k1, k2 = jax.random.split(key, 2)

    B, D, K = 32, 32, 3
    # bf16 features -> bf16 MXU operands with f32 accumulation in the kernel.
    vis_feat = jax.random.normal(k1, (B, D), jnp.float32).astype(jnp.bfloat16)
    text_feat = jax.random.normal(k2, (B, D), jnp.float32).astype(jnp.bfloat16)

    loss = hard_neg_loss(vis_feat, text_feat, K, tile_rows=16)
    loss = jax.block_until_ready(loss)

    ref = _reference_loss(vis_feat, text_feat, K)
    assert jnp.allclose(loss, ref, rtol=1e-3, atol=1e-3), (loss, ref)

    print("KERNEL_OK")
</pallas_src>

<mosaic_0001>
module attributes {stable_mosaic.version = 11 : i64} {
  func.func @_hard_neg_loss_kernel(%arg0: i32, %arg1: memref<16x32xbf16, #tpu.memory_space<vmem>>, %arg2: memref<16x32xbf16, #tpu.memory_space<vmem>>, %arg3: memref<32x32xbf16, #tpu.memory_space<vmem>>, %arg4: memref<32x32xbf16, #tpu.memory_space<vmem>>, %arg5: memref<1xf32, #tpu.memory_space<smem>>, %arg6: memref<1xf32, #tpu.memory_space<smem>>) attributes {dimension_semantics = [#tpu.dimension_semantics<arbitrary>], iteration_bounds = array<i64: 2>, scalar_prefetch = 0 : i64, scratch_operands = 1 : i64, tpu.core_type = #tpu.core_type<tc>, window_params = [{transform_indices = @transform_0, window_bounds = array<i64: 16, 32>}, {transform_indices = @transform_1, window_bounds = array<i64: 16, 32>}, {pipeline_mode = #tpu.pipeline_mode<synchronous>, transform_indices = @transform_2, window_bounds = array<i64: 32, 32>}, {pipeline_mode = #tpu.pipeline_mode<synchronous>, transform_indices = @transform_3, window_bounds = array<i64: 32, 32>}, {transform_indices = @transform_4, window_bounds = array<i64: 1>}]} {
    %c0_i32 = arith.constant 0 : i32
    %0 = arith.cmpi eq, %arg0, %c0_i32 : i32
    %1 = arith.extui %0 : i1 to i32
    %c0_i32_0 = arith.constant 0 : i32
    %2 = arith.cmpi ne, %1, %c0_i32_0 : i32
    scf.if %2 {
      %cst_36 = arith.constant 0.000000e+00 : f32
      %c0_37 = arith.constant 0 : index
      %143 = memref.load %arg6[%c0_37] : memref<1xf32, #tpu.memory_space<smem>>
      memref.store %cst_36, %arg6[%c0_37] : memref<1xf32, #tpu.memory_space<smem>>
    } else {
    }
    %c0 = arith.constant 0 : index
    %c0_1 = arith.constant 0 : index
    %3 = vector.load %arg1[%c0, %c0_1] : memref<16x32xbf16, #tpu.memory_space<vmem>>, vector<16x32xbf16>
    %c0_2 = arith.constant 0 : index
    %c0_3 = arith.constant 0 : index
    %4 = vector.load %arg2[%c0_2, %c0_3] : memref<16x32xbf16, #tpu.memory_space<vmem>>, vector<16x32xbf16>
    %c0_4 = arith.constant 0 : index
    %c0_5 = arith.constant 0 : index
    %5 = vector.load %arg3[%c0_4, %c0_5] : memref<32x32xbf16, #tpu.memory_space<vmem>>, vector<32x32xbf16>
    %c0_6 = arith.constant 0 : index
    %c0_7 = arith.constant 0 : index
    %6 = vector.load %arg4[%c0_6, %c0_7] : memref<32x32xbf16, #tpu.memory_space<vmem>>, vector<32x32xbf16>
    %cst = arith.constant dense<0.000000e+00> : vector<16x32xf32>
    %7 = tpu.matmul %3, %6, %cst {dimension_numbers = #tpu.dot_dimension_numbers<[1], [1], [0], [0], [0, 0, 1, 0], [], []>} : vector<16x32xbf16>, vector<32x32xbf16>, vector<16x32xf32> -> vector<16x32xf32>
    %cst_8 = arith.constant dense<0.000000e+00> : vector<16x32xf32>
    %8 = tpu.matmul %4, %5, %cst_8 {dimension_numbers = #tpu.dot_dimension_numbers<[1], [1], [0], [0], [0, 0, 1, 0], [], []>} : vector<16x32xbf16>, vector<32x32xbf16>, vector<16x32xf32> -> vector<16x32xf32>
    %9 = arith.extf %3 : vector<16x32xbf16> to vector<16x32xf32>
    %10 = arith.extf %4 : vector<16x32xbf16> to vector<16x32xf32>
    %11 = arith.mulf %9, %10 : vector<16x32xf32>
    %cst_9 = arith.constant dense<0.000000e+00> : vector<16xf32>
    %12 = vector.multi_reduction <add>, %11, %cst_9 [1] : vector<16x32xf32> to vector<16xf32>
    %13 = vector.shape_cast %12 : vector<16xf32> to vector<16x1xf32>
    %14 = tpu.iota {dimensions = array<i32: 0>} : vector<16x32xi32>
    %15 = tpu.iota {dimensions = array<i32: 1>} : vector<16x32xi32>
    %c16_i32 = arith.constant 16 : i32
    %16 = arith.muli %arg0, %c16_i32 : i32
    %17 = vector.broadcast %16 : i32 to vector<16x32xi32>
    %18 = arith.addi %14, %17 : vector<16x32xi32>
    %19 = arith.cmpi eq, %15, %18 : vector<16x32xi32>
    %cst_10 = arith.constant 1.000000e+04 : f32
    %20 = vector.broadcast %cst_10 : f32 to vector<16x32xf32>
    %21 = arith.subf %7, %20 : vector<16x32xf32>
    %22 = arith.select %19, %21, %7 : vector<16x32xi1>, vector<16x32xf32>
    %cst_11 = arith.constant 1.000000e+00 : f32
    %23 = vector.broadcast %cst_11 : f32 to vector<16x1xf32>
    %cst_12 = arith.constant dense<0xFF800000> : vector<16xf32>
    %24 = vector.multi_reduction <maximumf>, %22, %cst_12 [1] : vector<16x32xf32> to vector<16xf32>
    %25 = vector.shape_cast %24 : vector<16xf32> to vector<16x1xf32>
    %26 = vector.broadcast %25 : vector<16x1xf32> to vector<16x32xf32>
    %27 = arith.cmpf oeq, %22, %26 : vector<16x32xf32>
    %c32_i32 = arith.constant 32 : i32
    %28 = vector.broadcast %c32_i32 : i32 to vector<16x32xi32>
    %29 = arith.select %27, %15, %28 : vector<16x32xi1>, vector<16x32xi32>
    %cst_13 = arith.constant dense<2147483647> : vector<16xi32>
    %30 = vector.multi_reduction <minsi>, %29, %cst_13 [1] : vector<16x32xi32> to vector<16xi32>
    %31 = vector.shape_cast %30 : vector<16xi32> to vector<16x1xi32>
    %32 = vector.broadcast %31 : vector<16x1xi32> to vector<16x32xi32>
    %33 = arith.cmpi eq, %15, %32 : vector<16x32xi32>
    %cst_14 = arith.constant -1.000000e+30 : f32
    %34 = vector.broadcast %cst_14 : f32 to vector<16x32xf32>
    %35 = arith.select %33, %34, %22 : vector<16x32xi1>, vector<16x32xf32>
    %36 = arith.maximumf %13, %25 : vector<16x1xf32>
    %37 = arith.subf %13, %36 : vector<16x1xf32>
    %38 = math.exp %37 : vector<16x1xf32>
    %39 = arith.mulf %23, %38 : vector<16x1xf32>
    %40 = arith.subf %25, %36 : vector<16x1xf32>
    %41 = math.exp %40 : vector<16x1xf32>
    %42 = arith.addf %39, %41 : vector<16x1xf32>
    %cst_15 = arith.constant dense<0xFF800000> : vector<16xf32>
    %43 = vector.multi_reduction <maximumf>, %35, %cst_15 [1] : vector<16x32xf32> to vector<16xf32>
    %44 = vector.shape_cast %43 : vector<16xf32> to vector<16x1xf32>
    %45 = vector.broadcast %44 : vector<16x1xf32> to vector<16x32xf32>
    %46 = arith.cmpf oeq, %35, %45 : vector<16x32xf32>
    %c32_i32_16 = arith.constant 32 : i32
    %47 = vector.broadcast %c32_i32_16 : i32 to vector<16x32xi32>
    %48 = arith.select %46, %15, %47 : vector<16x32xi1>, vector<16x32xi32>
    %cst_17 = arith.constant dense<2147483647> : vector<16xi32>
    %49 = vector.multi_reduction <minsi>, %48, %cst_17 [1] : vector<16x32xi32> to vector<16xi32>
    %50 = vector.shape_cast %49 : vector<16xi32> to vector<16x1xi32>
    %51 = vector.broadcast %50 : vector<16x1xi32> to vector<16x32xi32>
    %52 = arith.cmpi eq, %15, %51 : vector<16x32xi32>
    %cst_18 = arith.constant -1.000000e+30 : f32
    %53 = vector.broadcast %cst_18 : f32 to vector<16x32xf32>
    %54 = arith.select %52, %53, %35 : vector<16x32xi1>, vector<16x32xf32>
    %55 = arith.maximumf %36, %44 : vector<16x1xf32>
    %56 = arith.subf %36, %55 : vector<16x1xf32>
    %57 = math.exp %56 : vector<16x1xf32>
    %58 = arith.mulf %42, %57 : vector<16x1xf32>
    %59 = arith.subf %44, %55 : vector<16x1xf32>
    %60 = math.exp %59 : vector<16x1xf32>
    %61 = arith.addf %58, %60 : vector<16x1xf32>
    %cst_19 = arith.constant dense<0xFF800000> : vector<16xf32>
    %62 = vector.multi_reduction <maximumf>, %54, %cst_19 [1] : vector<16x32xf32> to vector<16xf32>
    %63 = vector.shape_cast %62 : vector<16xf32> to vector<16x1xf32>
    %64 = arith.maximumf %55, %63 : vector<16x1xf32>
    %65 = arith.subf %55, %64 : vector<16x1xf32>
    %66 = math.exp %65 : vector<16x1xf32>
    %67 = arith.mulf %61, %66 : vector<16x1xf32>
    %68 = arith.subf %63, %64 : vector<16x1xf32>
    %69 = math.exp %68 : vector<16x1xf32>
    %70 = arith.addf %67, %69 : vector<16x1xf32>
    %71 = math.log %70 : vector<16x1xf32>
    %72 = arith.addf %64, %71 : vector<16x1xf32>
    %73 = arith.subf %72, %13 : vector<16x1xf32>
    %74 = vector.shape_cast %73 : vector<16x1xf32> to vector<1x16x1xf32>
    %cst_20 = arith.constant dense<0.000000e+00> : vector<1xf32>
    %75 = vector.multi_reduction <add>, %74, %cst_20 [1, 2] : vector<1x16x1xf32> to vector<1xf32>
    %76 = vector.shape_cast %75 : vector<1xf32> to vector<1x1x1xf32>
    %77 = vector.extract %76[0, 0, 0] : f32 from vector<1x1x1xf32>
    %cst_21 = arith.constant 1.000000e+04 : f32
    %78 = vector.broadcast %cst_21 : f32 to vector<16x32xf32>
    %79 = arith.subf %8, %78 : vector<16x32xf32>
    %80 = arith.select %19, %79, %8 : vector<16x32xi1>, vector<16x32xf32>
    %cst_22 = arith.constant 1.000000e+00 : f32
    %81 = vector.broadcast %cst_22 : f32 to vector<16x1xf32>
    %cst_23 = arith.constant dense<0xFF800000> : vector<16xf32>
    %82 = vector.multi_reduction <maximumf>, %80, %cst_23 [1] : vector<16x32xf32> to vector<16xf32>
    %83 = vector.shape_cast %82 : vector<16xf32> to vector<16x1xf32>
    %84 = vector.broadcast %83 : vector<16x1xf32> to vector<16x32xf32>
    %85 = arith.cmpf oeq, %80, %84 : vector<16x32xf32>
    %c32_i32_24 = arith.constant 32 : i32
    %86 = vector.broadcast %c32_i32_24 : i32 to vector<16x32xi32>
    %87 = arith.select %85, %15, %86 : vector<16x32xi1>, vector<16x32xi32>
    %cst_25 = arith.constant dense<2147483647> : vector<16xi32>
    %88 = vector.multi_reduction <minsi>, %87, %cst_25 [1] : vector<16x32xi32> to vector<16xi32>
    %89 = vector.shape_cast %88 : vector<16xi32> to vector<16x1xi32>
    %90 = vector.broadcast %89 : vector<16x1xi32> to vector<16x32xi32>
    %91 = arith.cmpi eq, %15, %90 : vector<16x32xi32>
    %cst_26 = arith.constant -1.000000e+30 : f32
    %92 = vector.broadcast %cst_26 : f32 to vector<16x32xf32>
    %93 = arith.select %91, %92, %80 : vector<16x32xi1>, vector<16x32xf32>
    %94 = arith.maximumf %13, %83 : vector<16x1xf32>
    %95 = arith.subf %13, %94 : vector<16x1xf32>
    %96 = math.exp %95 : vector<16x1xf32>
    %97 = arith.mulf %81, %96 : vector<16x1xf32>
    %98 = arith.subf %83, %94 : vector<16x1xf32>
    %99 = math.exp %98 : vector<16x1xf32>
    %100 = arith.addf %97, %99 : vector<16x1xf32>
    %cst_27 = arith.constant dense<0xFF800000> : vector<16xf32>
    %101 = vector.multi_reduction <maximumf>, %93, %cst_27 [1] : vector<16x32xf32> to vector<16xf32>
    %102 = vector.shape_cast %101 : vector<16xf32> to vector<16x1xf32>
    %103 = vector.broadcast %102 : vector<16x1xf32> to vector<16x32xf32>
    %104 = arith.cmpf oeq, %93, %103 : vector<16x32xf32>
    %c32_i32_28 = arith.constant 32 : i32
    %105 = vector.broadcast %c32_i32_28 : i32 to vector<16x32xi32>
    %106 = arith.select %104, %15, %105 : vector<16x32xi1>, vector<16x32xi32>
    %cst_29 = arith.constant dense<2147483647> : vector<16xi32>
    %107 = vector.multi_reduction <minsi>, %106, %cst_29 [1] : vector<16x32xi32> to vector<16xi32>
    %108 = vector.shape_cast %107 : vector<16xi32> to vector<16x1xi32>
    %109 = vector.broadcast %108 : vector<16x1xi32> to vector<16x32xi32>
    %110 = arith.cmpi eq, %15, %109 : vector<16x32xi32>
    %cst_30 = arith.constant -1.000000e+30 : f32
    %111 = vector.broadcast %cst_30 : f32 to vector<16x32xf32>
    %112 = arith.select %110, %111, %93 : vector<16x32xi1>, vector<16x32xf32>
    %113 = arith.maximumf %94, %102 : vector<16x1xf32>
    %114 = arith.subf %94, %113 : vector<16x1xf32>
    %115 = math.exp %114 : vector<16x1xf32>
    %116 = arith.mulf %100, %115 : vector<16x1xf32>
    %117 = arith.subf %102, %113 : vector<16x1xf32>
    %118 = math.exp %117 : vector<16x1xf32>
    %119 = arith.addf %116, %118 : vector<16x1xf32>
    %cst_31 = arith.constant dense<0xFF800000> : vector<16xf32>
    %120 = vector.multi_reduction <maximumf>, %112, %cst_31 [1] : vector<16x32xf32> to vector<16xf32>
    %121 = vector.shape_cast %120 : vector<16xf32> to vector<16x1xf32>
    %122 = arith.maximumf %113, %121 : vector<16x1xf32>
    %123 = arith.subf %113, %122 : vector<16x1xf32>
    %124 = math.exp %123 : vector<16x1xf32>
    %125 = arith.mulf %119, %124 : vector<16x1xf32>
    %126 = arith.subf %121, %122 : vector<16x1xf32>
    %127 = math.exp %126 : vector<16x1xf32>
    %128 = arith.addf %125, %127 : vector<16x1xf32>
    %129 = math.log %128 : vector<16x1xf32>
    %130 = arith.addf %122, %129 : vector<16x1xf32>
    %131 = arith.subf %130, %13 : vector<16x1xf32>
    %132 = vector.shape_cast %131 : vector<16x1xf32> to vector<1x16x1xf32>
    %cst_32 = arith.constant dense<0.000000e+00> : vector<1xf32>
    %133 = vector.multi_reduction <add>, %132, %cst_32 [1, 2] : vector<1x16x1xf32> to vector<1xf32>
    %134 = vector.shape_cast %133 : vector<1xf32> to vector<1x1x1xf32>
    %135 = vector.extract %134[0, 0, 0] : f32 from vector<1x1x1xf32>
    %136 = arith.addf %77, %135 : f32
    %c0_33 = arith.constant 0 : index
    %137 = memref.load %arg6[%c0_33] : memref<1xf32, #tpu.memory_space<smem>>
    %138 = arith.addf %137, %136 : f32
    %c0_34 = arith.constant 0 : index
    %139 = memref.load %arg6[%c0_34] : memref<1xf32, #tpu.memory_space<smem>>
    memref.store %138, %arg6[%c0_34] : memref<1xf32, #tpu.memory_space<smem>>
    %c1_i32 = arith.constant 1 : i32
    %140 = arith.cmpi eq, %arg0, %c1_i32 : i32
    %141 = arith.extui %140 : i1 to i32
    %c0_i32_35 = arith.constant 0 : i32
    %142 = arith.cmpi ne, %141, %c0_i32_35 : i32
    scf.if %142 {
      %c0_36 = arith.constant 0 : index
      %143 = memref.load %arg6[%c0_36] : memref<1xf32, #tpu.memory_space<smem>>
      %cst_37 = arith.constant 3.200000e+01 : f32
      %144 = arith.divf %143, %cst_37 : f32
      %c0_38 = arith.constant 0 : index
      %145 = memref.load %arg5[%c0_38] : memref<1xf32, #tpu.memory_space<smem>>
      memref.store %144, %arg5[%c0_38] : memref<1xf32, #tpu.memory_space<smem>>
    } else {
    }
    return
  }
  func.func @transform_0(%arg0: i32) -> (i32, i32) {
    %c0_i32 = arith.constant 0 : i32
    %c0_i32_0 = arith.constant 0 : i32
    return %arg0, %c0_i32 : i32, i32
  }
  func.func @transform_1(%arg0: i32) -> (i32, i32) {
    %c0_i32 = arith.constant 0 : i32
    %c0_i32_0 = arith.constant 0 : i32
    return %arg0, %c0_i32 : i32, i32
  }
  func.func @transform_2(%arg0: i32) -> (i32, i32) {
    %c0_i32 = arith.constant 0 : i32
    %c0_i32_0 = arith.constant 0 : i32
    %c0_i32_1 = arith.constant 0 : i32
    return %c0_i32, %c0_i32_0 : i32, i32
  }
  func.func @transform_3(%arg0: i32) -> (i32, i32) {
    %c0_i32 = arith.constant 0 : i32
    %c0_i32_0 = arith.constant 0 : i32
    %c0_i32_1 = arith.constant 0 : i32
    return %c0_i32, %c0_i32_0 : i32, i32
  }
  func.func @transform_4(%arg0: i32) -> i32 {
    %c0_i32 = arith.constant 0 : i32
    %c0_i32_0 = arith.constant 0 : i32
    return %c0_i32 : i32
  }
}

</mosaic_0001>

<bundles_post_ra>
// kernel: tpu_custom_call.1
= control target key start
LH: loop header
LB: loop body
LE: loop exit
PB: predicated region body
PF: predicated region fallthrough
CT: control target
= control target key end

     0   :  { %9 = vsyncpa [#allocation4], 0  ;;  %s1623_s0 = inlined_call_operand.hbm [shape: bf16[32,32], index: 0, kind: input, shape index: {}]   ;;  %s1624_s1 = inlined_call_operand.hbm [shape: bf16[32,32], index: 1, kind: input, shape index: {}]   ;;  %s1625_s2 = inlined_call_operand.hbm [shape: bf16[32,32], index: 2, kind: input, shape index: {}]   ;;  %s1626_s3 = inlined_call_operand.hbm [shape: bf16[32,32], index: 3, kind: input, shape index: {}]   ;;  %s1627_s4 = inlined_call_operand.hbm [shape: f32[1], index: 4, kind: output, shape index: {}]  }
   0x1   :  { %11 = vsyncpa [#allocation4 + $0x1], 0 }
   0x2   :  { %12 = vsyncpa [#allocation7], 0 }
   0x3   :  { %14 = vsyncpa [#allocation7 + $0x1], 0 }
   0x4   :  { %15 = vsyncpa [#allocation10], 0 }
   0x5   :  { %16 = vsyncpa [#allocation5], 0  ;;  %s1286_s15 = smov 0   ;;  %s1288_s16 = smov 0  }
   0x6   :  { %s1290_s17 = smov 0   ;;  %s1292_s18 = smov 0  }
   0x7 LB: > { %s1305_s19 = sadd.s32 4294967295, %s1252_s18   ;;  %p42_p0 = scmp.ne.s32.totalorder %s1244_s16, %s1240_s15  ;;  %s1252_s18 = sphi %s1292_s18, %s1634_s18   ;;  %s1248_s17 = sphi %s1290_s17, %s1633_s17   ;;  %s1244_s16 = sphi %s1288_s16, %s1632_s16   ;;  %s1240_s15 = sphi %s1286_s15, %s1631_s15  }
   0x8   : > { %p43_p1 = scmp.eq.s32.totalorder %s1305_s19, 0  ;;  %p865_p2 = scmp.ge.s32.totalorder %s1252_s18, 1 }
   0x9   : > { %p142_p3 = scmp.lt.s32.totalorder %s1252_s18, 3  ;;  %s153_s23 = sshll.u32 %s1625_s2, 4  ;;  %s154_s23 = int_to_ptr.hbm [resolvable:$true] %s153_s23 }
   0xa   : > { %p1313_p4 = por %p43_p1, %p42_p0  ;;  %s1254_s25 = smov [#allocation8]  }
   0xb   : > { %p1320_p5 = pnand %p865_p2, %p142_p3  ;;  %s155_s26 = sshll.u32 %s1254_s25, 4  ;;  %s156_s26 = int_to_ptr.vmem [resolvable:$true] %s155_s26 }
   0xc   : > { %s167_s29 = sshll.u32 %s1626_s3, 4  ;;  %s1255_s30 = smov 64   ;;  %s168_s29 = int_to_ptr.hbm [resolvable:$true] %s167_s29 }
   0xd   : > { %p949_p6 = pneg %p1320_p5  ;;  %s1256_s5 = smov 4  }
   0xe   : > { %s1257_s6 = smov [#allocation9]   ;;  %s1338_s8 = sadd.s32 1, %s1252_s18  }
   0xf   : > { %p950_p7 = pnand %p949_p6, %p43_p1  ;;  %s169_s7 = sshll.u32 %s1257_s6, 4  ;;  %s170_s7 = int_to_ptr.vmem [resolvable:$true] %s169_s7 }
  0x10   : > { %s29_s9 = sadd.s32 1, %s1248_s17  ;;  %s26_s10 = ssub.s32 %s1252_s18, %s1338_s8 }
  0x11   : > { %952 = dma.hbm_to_vmem [thread:$0]  (!%p950_p7), %s154_s23, 256, %s156_s26, [#allocation7], %s1255_s30, %s1255_s30, %s1256_s5  }
  0x12   : > { %955 = dma.hbm_to_vmem [thread:$0]  (!%p950_p7), %s168_s29, 256, %s170_s7, [#allocation10], %s1255_s30, %s1255_s30, %s1256_s5  }
  0x13   : > { %p36_p8 = scmp.ne.s32.totalorder %s1248_s17, %s1244_s16  ;;  %p27_p9 = scmp.eq.s32.totalorder %s26_s10, 0 }
  0x14   : > { %p37_p10 = scmp.eq.s32.totalorder %s1252_s18, 0  ;;  %p965_p11 = scmp.lt.s32.totalorder %s1252_s18, 2 }
  0x15   : > { %s183_s11 = sand.u32 1, %s1248_s17   ;;  %s917_s14 = sshll.u32 %s1252_s18, 3 }
  0x16   : > { %s1349_s12 = scalar_select %p27_p9, %s1248_s17, %s29_s9  }
  0x17   : > { %p38_p12 = por %p37_p10, %p36_p8  ;;  %s869_s13 = sshll.u32 %s183_s11, 3 }
  0x18   : > { %s192_s22 = scalar_lea.hbm %s1623_s0, %s917_s14  ;;  %s187_s25 = scalar_lea.vmem [#allocation3], %s869_s13 }
  0x19   : > { %s193_s23 = sshll.u32 %s192_s22, 4  ;;  %s195_s26 = sshll.u32 %s187_s25, 4  ;;  %s194_s23 = int_to_ptr.hbm [resolvable:$true] %s193_s23  ;;  %s196_s26 = int_to_ptr.vmem [resolvable:$true] %s195_s26 }
  0x1a   : > { %p1355_p13 = pnand %p965_p11, %p38_p12  ;;  %s214_s6 = scalar_lea.hbm %s1624_s1, %s917_s14 }
  0x1b   : > { %s209_s7 = scalar_lea.vmem [#allocation6], %s869_s13  ;;  %s215_s10 = sshll.u32 %s214_s6, 4  ;;  %s216_s10 = int_to_ptr.hbm [resolvable:$true] %s215_s10 }
  0x1c   : > { %s1362_s9 = sshll.u32 %s209_s7, 4  ;;  %s184_s15 = scalar_lea.sflag [#allocation4], %s183_s11  ;;  %s218_s9 = int_to_ptr.vmem [resolvable:$true] %s1362_s9 }
  0x1d   : > { %s1128_s21 = sshra.s32 %s194_s23, 4  ;;  %p1132_p2 = pneg %p1355_p13  ;;  %s1129_s21 = int_to_ptr.hbm [resolvable:$true] %s1128_s21 }
  0x1e   : > { %s1130_s22 = scalar_lea.hbm %s1129_s21, 8  ;;  %s1135_s29 = scalar_lea.hbm %s1623_s0, 16 }
  0x1f   : > { %p1131_p0 = scmp.ne.s32.totalorder %s1129_s21, %s1130_s22  ;;  %p1136_p7 = scmp.lt.s32.totalorder %s1129_s21, %s1623_s0 }
  0x20   : > { %p1137_p8 = scmp.lt.s32.totalorder %s1135_s29, %s1130_s22 }
  0x21   : > { %p1133_p3 = pnand %p1132_p2, %p1131_p0 }
  0x22   : > { %p1138_p9 = por %p1137_p8, %p1136_p7 }
  0x23   : > { %p1134_p6 = pneg %p1133_p3 }
  0x25   : > { %p1139_p10 = pnand %p1138_p9, %p1134_p6 }
  0x27   : > { %1142 = shalt.err (!%p1139_p10)
}
  0x28   : > { %959 = dma.hbm_to_vmem [thread:$0]  (!%p1355_p13), %s194_s23, 128, %s196_s26, %s184_s15, %s1255_s30, %s1255_s30, %s1256_s5  }
  0x29   : > { %s205_s11 = sand.u32 1, %s1252_s18   ;;  %s1158_s7 = sshra.s32 %s216_s10, 4  ;;  %s1159_s7 = int_to_ptr.hbm [resolvable:$true] %s1158_s7 }
  0x2a   : > { %s206_s6 = scalar_lea.sflag [#allocation7], %s205_s11  ;;  %s1160_s21 = scalar_lea.hbm %s1159_s7, 8 }
  0x2b   : > { %p1161_p11 = scmp.ne.s32.totalorder %s1159_s7, %s1160_s21  ;;  %s1165_s28 = scalar_lea.hbm %s1624_s1, 16 }
  0x2c   : > { %p1166_p3 = scmp.lt.s32.totalorder %s1159_s7, %s1624_s1  ;;  %p1167_p6 = scmp.lt.s32.totalorder %s1165_s28, %s1160_s21 }
  0x2d   : > { %p1163_p12 = pnand %p1161_p11, %p1132_p2 }
  0x2e   : > { %p1168_p7 = por %p1167_p6, %p1166_p3 }
  0x2f   : > { %p1164_p0 = pneg %p1163_p12 }
  0x31   : > { %p1169_p8 = pnand %p1168_p7, %p1164_p0 }
  0x33   : > { %1172 = shalt.err (!%p1169_p8)
}
  0x34   : > { %962 = dma.hbm_to_vmem [thread:$0]  (!%p1355_p13), %s216_s10, 128, %s218_s9, %s206_s6, %s1255_s30, %s1255_s30, %s1256_s5  }
  0x35   : > { %229 = sbr.rel (%p1320_p5) target bundleno = 1362 (0x552), region = 36  ;;  %s231_s18 = sand.u32 (!%p1320_p5), 1, %s1244_s16  }
  0x36   : > { %s1399_s23 = sshll.u32 (!%p1320_p5), %s231_s18, 3  ;;  %s232_s26 = scalar_lea.sflag (!%p1320_p5), [#allocation4], %s231_s18 }
  0x37   : > { %s235_s15 = scalar_lea.vmem (!%p1320_p5), [#allocation3], %s1399_s23 }
  0x3a   : > { %1219 = dma.done.wait (%p1313_p4), %s232_s26, 128  }
  0x3b   : > { %1221 = vsyncadd (%p1313_p4), %s232_s26, 4294967168  ;;  %s241_s30 = sand.u32 1, %s1305_s19   ;;  %s245_s24 = scalar_lea.vmem [#allocation6], %s1399_s23 }
  0x3c   : > { %s242_s5 = scalar_lea.sflag [#allocation7], %s241_s30 }
  0x3d   : > { %1223 = dma.done.wait (%p1313_p4), %s242_s5, 128  }
  0x3e   : > { %1225 = vsyncadd (%p1313_p4), %s242_s5, 4294967168 }
  0x3f   : > { %1227 = dma.done.wait (%p43_p1), [#allocation7], 256  }
  0x40   : > { %1229 = vsyncadd (%p43_p1), [#allocation7], 4294967040 }
  0x41   : > { %1231 = dma.done.wait (%p43_p1), [#allocation10], 256  }
  0x42   : > { %1233 = vsyncadd (%p43_p1), [#allocation10], 4294967040  ;;  %vm317_vm0 = vcmask 261120   ;;  %v924_v0 = vld [vmem:[#allocation9 + $0x8] sm:$0xff]  ;;  %v922_v1 = vld [vmem:[#allocation8 + $0x8] sm:$0xff]  ;;  %v391_v10 = vlaneseq  ;;  %s907_s20 = sshll.u32 %s1305_s19, 4 }
  0x43   : > { %v325_v2 = vsel %vm317_vm0, %v924_v0, 0  ;;  %v363_v3 = vsel %vm317_vm0, %v922_v1, 0  ;;  %v923_v4 = vld [vmem:[#allocation9] sm:$0xff]  ;;  %v921_v5 = vld [vmem:[#allocation8] sm:$0xff]  ;;  %v397_v12 = vstv %s907_s20  ;;  %s1258_s27 = smov 0.0  }
  0x44   : > { %333 = vmatpush.bf16.xpose.msra.mxu0 %v325_v2  ;;  %371 = vmatpush.bf16.xpose.msra.mxu1 %v363_v3  ;;  %v322_v6 = vsel %vm317_vm0, %v923_v4, 0  ;;  %v360_v7 = vsel %vm317_vm0, %v921_v5, 0  ;;  %v919_v8 = vld [vmem:[%s235_s15] sm:$0xff]  ;;  %v920_v9 = vld [vmem:[%s245_s24] sm:$0xff]  ;;  %v392_v11 = vshrl.u32 %v391_v10, 7  ;;  %v1431_v13 = vand.u32 127, %v391_v10 }
  0x45   : > { %944 = sst [smem:[#allocation2]] (%p43_p1), %s1258_s27  ;;  %p912_p1 = scmp.ne.s32.totalorder %s1305_s19, 1 }
  0x46   : > { %v398_v14 = vadd.s32 %v397_v12, %v392_v11  ;;  %v393_v17 = vadd.s32 8, %v392_v11  ;;  %s744_s9 = sld [smem:[#allocation2]] }
  0x48   : > { %vm400_vm1 = vcmp.eq.s32.totalorder %v1431_v13, %v398_v14  ;;  %v399_v24 = vadd.s32 %v397_v12, %v393_v17 }
  0x4a   : > { %vm401_vm2 = vcmp.eq.s32.totalorder %v1431_v13, %v399_v24 }
  0x4c   : > { %334 = vmatpush.bf16.xpose.msra.mxu0 %v322_v6  ;;  %372 = vmatpush.bf16.xpose.msra.mxu1 %v360_v7 }
  0x53   : > { %893 = vmatmul.msk.bf16.vlgmr.msra.gmra.mxu0 %vm317_vm0, %v919_v8  ;;  %906 = vmatmul.msk.bf16.vlgmr.msra.gmra.mxu1 %vm317_vm0, %v920_v9 }
  0xd0   : > { %v336_v15 = vpop.f32.mrf.mxu0  ;;  %v374_v16 = vpop.f32.mrf.mxu1 }
  0xd1   : > { %v908_v18 = vadd.f32 -10000.0, %v336_v15  ;;  %v910_v19 = vadd.f32 -10000.0, %v374_v16 }
  0xd3   : > { %v1434_v20 = vsel %vm400_vm1, %v908_v18, %v336_v15  ;;  %v1436_v21 = vsel %vm400_vm1, %v910_v19, %v374_v16 }
  0xd4   : > { %v577_v22 = vsel %vm317_vm0, %v1436_v21, -inf  ;;  %v406_v23 = vsel %vm317_vm0, %v1434_v20, -inf }
  0xd5   : > { %578 = vmax.xlane.f32.xlu1 %v577_v22  ;;  %407 = vmax.xlane.f32.xlu0 %v406_v23 }
  0xd8   : > { %v338_v25 = vpop.f32.mrf.mxu0  ;;  %v376_v26 = vpop.f32.mrf.mxu1 }
  0xd9   : > { %v909_v27 = vadd.f32 -10000.0, %v338_v25  ;;  %v911_v28 = vadd.f32 -10000.0, %v376_v26 }
  0xdb   : > { %v1443_v29 = vsel %vm401_vm2, %v909_v27, %v338_v25  ;;  %v1445_v30 = vsel %vm401_vm2, %v911_v28, %v376_v26 }
  0xdc   : > { %v580_v31 = vsel %vm317_vm0, %v1445_v30, -inf  ;;  %v409_v32 = vsel %vm317_vm0, %v1443_v29, -inf }
  0xdd   : > { %581 = vmax.xlane.f32.xlu1 %v580_v31  ;;  %410 = vmax.xlane.f32.xlu0 %v409_v32 }
 0x148   : > { %v1451_v33 = vpop.xlane.xlu1 %578  ;;  %v1453_v34 = vpop.xlane.xlu0 %407 }
 0x149   : > { %vm583_vm3 = vcmp.eq.f32.partialorder %v1436_v21, %v1451_v33  ;;  %vm412_vm4 = vcmp.eq.f32.partialorder %v1434_v20, %v1453_v34 }
 0x14a   : > { %v414_v35 = vsel %vm412_vm4, %v1431_v13, 32  ;;  %v585_v36 = vsel %vm583_vm3, %v1431_v13, 32 }
 0x14b   : > { %v416_v37 = vsel %vm317_vm0, %v414_v35, 2147483647  ;;  %v587_v38 = vsel %vm317_vm0, %v585_v36, 2147483647 }
 0x14c   : > { %v418_v39 = vshra.s32 %v416_v37, 16  ;;  %v589_v40 = vshra.s32 %v587_v38, 16  ;;  %v417_v53 = vand.u32 65535, %v416_v37  ;;  %v588_v54 = vand.u32 65535, %v587_v38 }
 0x14e   : > { %v420_v41 = vcvt.s32.f32 %v418_v39  ;;  %v591_v42 = vcvt.s32.f32 %v589_v40  ;;  %v419_v57 = vcvt.s32.f32 %v417_v53  ;;  %v590_v58 = vcvt.s32.f32 %v588_v54 }
 0x150   : > { %v1463_v43 = vpop.xlane.xlu1 %581  ;;  %421 = vmin.xlane.f32.xlu2 %v420_v41  ;;  %592 = vmin.xlane.f32.xlu0 %v591_v42  ;;  %v1465_v44 = vpop.xlane.xlu0 %410 }
 0x151   : > { %vm584_vm5 = vcmp.eq.f32.partialorder %v1445_v30, %v1463_v43  ;;  %vm413_vm6 = vcmp.eq.f32.partialorder %v1443_v29, %v1465_v44 }
 0x152   : > { %v586_v45 = vsel %vm584_vm5, %v1431_v13, 32  ;;  %v415_v46 = vsel %vm413_vm6, %v1431_v13, 32 }
 0x153   : > { %v602_v47 = vsel %vm317_vm0, %v586_v45, 2147483647  ;;  %v431_v48 = vsel %vm317_vm0, %v415_v46, 2147483647 }
 0x154   : > { %v604_v49 = vshra.s32 %v602_v47, 16  ;;  %v433_v50 = vshra.s32 %v431_v48, 16  ;;  %v603_v61 = vand.u32 65535, %v602_v47  ;;  %v432_v62 = vand.u32 65535, %v431_v48 }
 0x156   : > { %v606_v51 = vcvt.s32.f32 %v604_v49  ;;  %v435_v52 = vcvt.s32.f32 %v433_v50  ;;  %v605_v1 = vcvt.s32.f32 %v603_v61  ;;  %v434_v2 = vcvt.s32.f32 %v432_v62  ;;  %v293_v61 = vld [vmem:[%s245_s24] sm:$0xff]  }
 0x158   : > { %607 = vmin.xlane.f32.xlu1 %v606_v51  ;;  %436 = vmin.xlane.f32.xlu2 %v435_v52 }
 0x1c3   : > { %v422_v55 = vpop.xlane.xlu2 %421  ;;  %v593_v56 = vpop.xlane.xlu0 %592 }
 0x1c4   : > { %vm423_vm7 = vcmp.eq.f32.partialorder %v420_v41, %v422_v55  ;;  %vm594_vm8 = vcmp.eq.f32.partialorder %v591_v42, %v593_v56  ;;  %v428_v5 = vcvt.f32.s32 %v422_v55  ;;  %v599_v6 = vcvt.f32.s32 %v593_v56 }
 0x1c5   : > { %v424_v59 = vsel %vm423_vm7, %v419_v57, inf  ;;  %v595_v60 = vsel %vm594_vm8, %v590_v58, inf }
 0x1c6   : > { %425 = vmin.xlane.f32.xlu2 %v424_v59  ;;  %596 = vmin.xlane.f32.xlu1 %v595_v60  ;;  %v429_v9 = vshll.u32 %v428_v5, 16  ;;  %v600_v10 = vshll.u32 %v599_v6, 16  ;;  %v291_v60 = vld [vmem:[%s235_s15] sm:$0xff]  }
 0x1cb   : > { %v608_v63 = vpop.xlane.xlu1 %607  ;;  %v437_v0 = vpop.xlane.xlu2 %436 }
 0x1cc   : > { %vm609_vm9 = vcmp.eq.f32.partialorder %v606_v51, %v608_v63  ;;  %vm438_vm10 = vcmp.eq.f32.partialorder %v435_v52, %v437_v0  ;;  %v614_v16 = vcvt.f32.s32 %v608_v63  ;;  %v443_v17 = vcvt.f32.s32 %v437_v0 }
 0x1cd   : > { %v610_v3 = vsel %vm609_vm9, %v605_v1, inf  ;;  %v439_v4 = vsel %vm438_vm10, %v434_v2, inf  ;;  %v380_v2 = vunpack.c.h.bf16 %v291_v60 }
 0x1ce   : > { %611 = vmin.xlane.f32.xlu2 %v610_v3  ;;  %440 = vmin.xlane.f32.xlu0 %v439_v4  ;;  %v615_v26 = vshll.u32 %v614_v16, 16  ;;  %v444_v27 = vshll.u32 %v443_v17, 16  ;;  %v382_v3 = vunpack.c.h.bf16 %v293_v61 }
 0x239   : > { %v426_v7 = vpop.xlane.xlu2 %425  ;;  %v597_v8 = vpop.xlane.xlu1 %596 }
 0x23a   : > { %v427_v11 = vcvt.f32.s32 %v426_v7  ;;  %v598_v12 = vcvt.f32.s32 %v597_v8  ;;  %v384_v8 = vmul.f32 %v382_v3, %v380_v2 }
 0x23c   : > { %v430_v14 = vadd.s32 %v429_v9, %v427_v11  ;;  %v601_v15 = vadd.s32 %v600_v10, %v598_v12  ;;  %v388_v16 = vsel %vm317_vm0, %v384_v8, 0.0 }
 0x23e   : > { %vm446_vm11 = vcmp.eq.s32.totalorder %v1431_v13, %v430_v14  ;;  %vm617_vm12 = vcmp.eq.s32.totalorder %v1431_v13, %v601_v15  ;;  %v379_v14 = vunpack.c.l.bf16 %v291_v60  ;;  %v381_v15 = vunpack.c.l.bf16 %v293_v61 }
 0x23f   : > { %v1478_v18 = vsel %vm446_vm11, -1e+30, %v1434_v20  ;;  %v1481_v19 = vsel %vm617_vm12, -1e+30, %v1436_v21 }
 0x240   : > { %v466_v22 = vsel %vm317_vm0, %v1478_v18, -inf  ;;  %v637_v23 = vsel %vm317_vm0, %v1481_v19, -inf }
 0x241   : > { %v612_v24 = vpop.xlane.xlu2 %611  ;;  %467 = vmax.xlane.f32.xlu0 %v466_v22  ;;  %638 = vmax.xlane.f32.xlu2 %v637_v23  ;;  %v441_v25 = vpop.xlane.xlu0 %440  ;;  %v383_v23 = vmul.f32 %v381_v15, %v379_v14 }
 0x242   : > { %v613_v28 = vcvt.f32.s32 %v612_v24  ;;  %v442_v31 = vcvt.f32.s32 %v441_v25 }
 0x243   : > { %v385_v24 = vsel %vm317_vm0, %v383_v23, 0.0 }
 0x244   : > { %v616_v32 = vadd.s32 %v615_v26, %v613_v28  ;;  %v445_v20 = vadd.s32 %v444_v27, %v442_v31 }
 0x246   : > { %vm618_vm13 = vcmp.eq.s32.totalorder %v1431_v13, %v616_v32  ;;  %vm447_vm14 = vcmp.eq.s32.totalorder %v1431_v13, %v445_v20 }
 0x247   : > { %v1490_v21 = vsel %vm618_vm13, -1e+30, %v1445_v30  ;;  %v1493_v35 = vsel %vm447_vm14, -1e+30, %v1443_v29 }
 0x248   : > { %v640_v36 = vsel %vm317_vm0, %v1490_v21, -inf  ;;  %v469_v37 = vsel %vm317_vm0, %v1493_v35, -inf }
 0x249   : > { %641 = vmax.xlane.f32.xlu0 %v640_v36  ;;  %470 = vmax.xlane.f32.xlu1 %v469_v37 }
 0x2b4   : > { %v1499_v38 = vpop.xlane.xlu2 %638  ;;  %v1501_v39 = vpop.xlane.xlu0 %467 }
 0x2b5   : > { %vm643_vm15 = vcmp.eq.f32.partialorder %v1481_v19, %v1499_v38  ;;  %vm472_vm1 = vcmp.eq.f32.partialorder %v1478_v18, %v1501_v39 }
 0x2b6   : > { %v645_v29 = vsel %vm643_vm15, %v1431_v13, 32  ;;  %v474_v30 = vsel %vm472_vm1, %v1431_v13, 32 }
 0x2b7   : > { %v647_v40 = vsel %vm317_vm0, %v645_v29, 2147483647  ;;  %v476_v41 = vsel %vm317_vm0, %v474_v30, 2147483647 }
 0x2b8   : > { %v649_v42 = vshra.s32 %v647_v40, 16  ;;  %v478_v45 = vshra.s32 %v476_v41, 16  ;;  %v477_v58 = vand.u32 65535, %v476_v41  ;;  %v648_v59 = vand.u32 65535, %v647_v40 }
 0x2ba   : > { %v651_v46 = vcvt.s32.f32 %v649_v42  ;;  %v480_v47 = vcvt.s32.f32 %v478_v45  ;;  %v479_v0 = vcvt.s32.f32 %v477_v58  ;;  %v650_v1 = vcvt.s32.f32 %v648_v59 }
 0x2bc   : > { %652 = vmin.xlane.f32.xlu0 %v651_v46  ;;  %v1511_v48 = vpop.xlane.xlu1 %470  ;;  %481 = vmin.xlane.f32.xlu1 %v480_v47  ;;  %v1513_v49 = vpop.xlane.xlu0 %641 }
 0x2bd   : > { %vm473_vm2 = vcmp.eq.f32.partialorder %v1493_v35, %v1511_v48  ;;  %vm644_vm3 = vcmp.eq.f32.partialorder %v1490_v21, %v1513_v49 }
 0x2be   : > { %v475_v50 = vsel %vm473_vm2, %v1431_v13, 32  ;;  %v646_v51 = vsel %vm644_vm3, %v1431_v13, 32 }
 0x2bf   : > { %v491_v52 = vsel %vm317_vm0, %v475_v50, 2147483647  ;;  %v662_v53 = vsel %vm317_vm0, %v646_v51, 2147483647 }
 0x2c0   : > { %v493_v54 = vshra.s32 %v491_v52, 16  ;;  %v664_v55 = vshra.s32 %v662_v53, 16  ;;  %v492_v6 = vand.u32 65535, %v491_v52  ;;  %v663_v7 = vand.u32 65535, %v662_v53 }
 0x2c2   : > { %v495_v56 = vcvt.s32.f32 %v493_v54  ;;  %v666_v57 = vcvt.s32.f32 %v664_v55  ;;  %v494_v11 = vcvt.s32.f32 %v492_v6  ;;  %v665_v12 = vcvt.s32.f32 %v663_v7 }
 0x2c4   : > { %496 = vmin.xlane.f32.xlu2 %v495_v56  ;;  %667 = vmin.xlane.f32.xlu1 %v666_v57 }
 0x32f   : > { %v482_v62 = vpop.xlane.xlu1 %481  ;;  %v653_v63 = vpop.xlane.xlu0 %652 }
 0x330   : > { %vm483_vm4 = vcmp.eq.f32.partialorder %v480_v47, %v482_v62  ;;  %vm654_vm5 = vcmp.eq.f32.partialorder %v651_v46, %v653_v63  ;;  %v488_v25 = vcvt.f32.s32 %v482_v62  ;;  %v659_v26 = vcvt.f32.s32 %v653_v63 }
 0x331   : > { %v484_v4 = vsel %vm483_vm4, %v479_v0, inf  ;;  %v655_v5 = vsel %vm654_vm5, %v650_v1, inf }
 0x332   : > { %485 = vmin.xlane.f32.xlu2 %v484_v4  ;;  %656 = vmin.xlane.f32.xlu1 %v655_v5  ;;  %v489_v31 = vshll.u32 %v488_v25, 16  ;;  %v660_v32 = vshll.u32 %v659_v26, 16 }
 0x337   : > { %v497_v9 = vpop.xlane.xlu2 %496  ;;  %v668_v10 = vpop.xlane.xlu1 %667 }
 0x338   : > { %vm498_vm6 = vcmp.eq.f32.partialorder %v495_v56, %v497_v9  ;;  %vm669_vm7 = vcmp.eq.f32.partialorder %v666_v57, %v668_v10  ;;  %v503_v30 = vcvt.f32.s32 %v497_v9  ;;  %v674_v40 = vcvt.f32.s32 %v668_v10 }
 0x339   : > { %v499_v17 = vsel %vm498_vm6, %v494_v11, inf  ;;  %v670_v22 = vsel %vm669_vm7, %v665_v12, inf }
 0x33a   : > { %500 = vmin.xlane.f32.xlu0 %v499_v17  ;;  %671 = vmin.xlane.f32.xlu2 %v670_v22  ;;  %v504_v51 = vshll.u32 %v503_v30, 16  ;;  %v675_v52 = vshll.u32 %v674_v40, 16 }
 0x33b   : > { %389 = vadd.xlane.f32.xlu1 %v388_v16 }
 0x342   : > { %386 = vadd.xlane.f32.xlu0 %v385_v24 }
 0x3a5   : > { %v486_v27 = vpop.xlane.xlu2 %485  ;;  %v657_v28 = vpop.xlane.xlu1 %656 }
 0x3a6   : > { %v487_v20 = vcvt.f32.s32 %v486_v27  ;;  %v658_v36 = vcvt.f32.s32 %v657_v28 }
 0x3a8   : > { %v490_v37 = vadd.s32 %v489_v31, %v487_v20  ;;  %v661_v29 = vadd.s32 %v660_v32, %v658_v36 }
 0x3aa   : > { %vm506_vm8 = vcmp.eq.s32.totalorder %v1431_v13, %v490_v37  ;;  %vm677_vm9 = vcmp.eq.s32.totalorder %v1431_v13, %v661_v29 }
 0x3ab   : > { %v508_v41 = vsel %vm506_vm8, -1e+30, %v1478_v18  ;;  %v679_v42 = vsel %vm677_vm9, -1e+30, %v1481_v19 }
 0x3ac   : > { %v528_v45 = vsel %vm317_vm0, %v508_v41, -inf  ;;  %v699_v46 = vsel %vm317_vm0, %v679_v42, -inf }
 0x3ad   : > { %529 = vmax.xlane.f32.xlu2 %v528_v45  ;;  %v672_v47 = vpop.xlane.xlu2 %671  ;;  %700 = vmax.xlane.f32.xlu1 %v699_v46  ;;  %v501_v50 = vpop.xlane.xlu0 %500 }
 0x3ae   : > { %v673_v53 = vcvt.f32.s32 %v672_v47  ;;  %v502_v54 = vcvt.f32.s32 %v501_v50  ;;  %v1541_v59 = vpop.xlane.xlu1 %389 }
 0x3af   : > { %v451_v61 = vmax.f32 %v1541_v59, %v1465_v44  ;;  %v622_v1 = vmax.f32 %v1541_v59, %v1463_v43 }
 0x3b0   : > { %v676_v55 = vadd.s32 %v675_v52, %v673_v53  ;;  %v505_v56 = vadd.s32 %v504_v51, %v502_v54 }
 0x3b1   : > { %v459_v6 = vsub.f32 %v1465_v44, %v451_v61  ;;  %v624_v10 = vsub.f32 %v1541_v59, %v622_v1  ;;  %v1563_v11 = vmax.f32 %v622_v1, %v1513_v49  ;;  %v630_v16 = vsub.f32 %v1463_v43, %v622_v1 }
 0x3b2   : > { %vm678_vm10 = vcmp.eq.s32.totalorder %v1431_v13, %v676_v55  ;;  %vm507_vm11 = vcmp.eq.s32.totalorder %v1431_v13, %v505_v56  ;;  %v1568_v22 = vmax.f32 %v451_v61, %v1511_v48 }
 0x3b3   : > { %v680_v18 = vsel %vm678_vm10, -1e+30, %v1490_v21  ;;  %v509_v19 = vsel %vm507_vm11, -1e+30, %v1493_v35  ;;  %v453_v35 = vsub.f32 %v1541_v59, %v451_v61  ;;  %v462_v15 = vmul.f32 1.442695, %v459_v6 }
 0x3b4   : > { %v702_v57 = vsel %vm317_vm0, %v680_v18, -inf  ;;  %v531_v58 = vsel %vm317_vm0, %v509_v19, -inf  ;;  %v627_v17 = vmul.f32 1.442695, %v624_v10  ;;  %v684_v44 = vsub.f32 %v622_v1, %v1563_v11 }
 0x3b5   : > { %703 = vmax.xlane.f32.xlu2 %v702_v57  ;;  %532 = vmax.xlane.f32.xlu0 %v531_v58  ;;  %v1543_v60 = vpop.xlane.xlu0 %386  ;;  %v456_v3 = vmul.f32 1.442695, %v453_v35  ;;  %v633_v25 = vmul.f32 1.442695, %v630_v16  ;;  %v513_v20 = vsub.f32 %v451_v61, %v1568_v22  ;;  %v692_v55 = vsub.f32 %v1513_v49, %v1563_v11 }
 0x3b6   : > { %v450_v13 = vmax.f32 %v1543_v60, %v1453_v34  ;;  %v621_v21 = vmax.f32 %v1543_v60, %v1451_v33  ;;  %v687_v32 = vmul.f32 1.442695, %v684_v44  ;;  %vm560_vm0 = vcmask 7168  }
 0x3b7   : > { %1010 = vpow2.f32 %v456_v3  ;;  %v516_v51 = vmul.f32 1.442695, %v513_v20  ;;  %v695_v35 = vmul.f32 1.442695, %v692_v55 }
 0x3b8   : > { %v452_v62 = vsub.f32 %v1543_v60, %v450_v13  ;;  %v458_v63 = vsub.f32 %v1453_v34, %v450_v13  ;;  %v510_v0 = vmax.f32 %v450_v13, %v1501_v39  ;;  %v623_v2 = vsub.f32 %v1543_v60, %v621_v21 }
 0x3b9   : > { %v629_v4 = vsub.f32 %v1451_v33, %v621_v21  ;;  %v681_v5 = vmax.f32 %v621_v21, %v1499_v38 }
 0x3ba   : > { %v454_v7 = vmul.f32 1.442695, %v452_v62  ;;  %v460_v8 = vmul.f32 1.442695, %v458_v63  ;;  %v512_v9 = vsub.f32 %v450_v13, %v510_v0  ;;  %v625_v34 = vmul.f32 1.442695, %v623_v2 }
 0x3bb   : > { %v631_v12 = vmul.f32 1.442695, %v629_v4  ;;  %v683_v14 = vsub.f32 %v621_v21, %v681_v5  ;;  %v520_v23 = vsub.f32 %v1501_v39, %v510_v0  ;;  %v691_v26 = vsub.f32 %v1499_v38, %v681_v5 }
 0x3bc   : > { %1012 = vpow2.f32 %v454_v7  ;;  %v514_v33 = vmul.f32 1.442695, %v512_v9  ;;  %v521_v62 = vsub.f32 %v1511_v48, %v1568_v22 }
 0x3bd   : > { %1014 = vpow2.f32 %v460_v8  ;;  %v685_v24 = vmul.f32 1.442695, %v683_v14  ;;  %v1572_v27 = vpop.eup %1010  ;;  %v522_v37 = vmul.f32 1.442695, %v520_v23  ;;  %v693_v38 = vmul.f32 1.442695, %v691_v26 }
 0x3be   : > { %1016 = vpow2.f32 %v625_v34  ;;  %v524_v10 = vmul.f32 1.442695, %v521_v62 }
 0x3bf   : > { %1018 = vpow2.f32 %v631_v12 }
 0x3c0   : > { %1020 = vpow2.f32 %v462_v15 }
 0x3c1   : > { %1022 = vpow2.f32 %v514_v33 }
 0x3c2   : > { %v1013_v43 = vpop.eup %1012  ;;  %1024 = vpow2.f32 %v627_v17 }
 0x3c3   : > { %v1015_v36 = vpop.eup %1014  ;;  %1026 = vpow2.f32 %v685_v24 }
 0x3c4   : > { %v1017_v30 = vpop.eup %1016  ;;  %1028 = vpow2.f32 %v633_v25  ;;  %v464_v50 = vadd.f32 %v1015_v36, %v1013_v43 }
 0x3c5   : > { %v1019_v40 = vpop.eup %1018  ;;  %1030 = vpow2.f32 %v687_v32 }
 0x3c6   : > { %v1021_v47 = vpop.eup %1020  ;;  %1032 = vpow2.f32 %v522_v37  ;;  %v635_v19 = vadd.f32 %v1019_v40, %v1017_v30 }
 0x3c7   : > { %v1023_v52 = vpop.eup %1022  ;;  %1034 = vpow2.f32 %v693_v38 }
 0x3c8   : > { %v1025_v56 = vpop.eup %1024  ;;  %v518_v13 = vmul.f32 %v1023_v52, %v464_v50 }
 0x3c9   : > { %v1027_v57 = vpop.eup %1026 }
 0x3ca   : > { %v1029_v61 = vpop.eup %1028  ;;  %v689_v49 = vmul.f32 %v1027_v57, %v635_v19 }
 0x3cb   : > { %v636_v9 = vadd.f32 %v1029_v61, %v1025_v56 }
 0x420   : > { %v530_v28 = vpop.xlane.xlu2 %529  ;;  %v701_v31 = vpop.xlane.xlu1 %700 }
 0x421   : > { %v1575_v29 = vmax.f32 %v510_v0, %v530_v28  ;;  %v1577_v39 = vmax.f32 %v681_v5, %v701_v31 }
 0x423   : > { %v536_v41 = vsub.f32 %v510_v0, %v1575_v29  ;;  %v544_v42 = vsub.f32 %v530_v28, %v1575_v29  ;;  %v707_v45 = vsub.f32 %v681_v5, %v1577_v39  ;;  %v715_v46 = vsub.f32 %v701_v31, %v1577_v39  ;;  %v1031_v0 = vpop.eup %1030 }
 0x424   : > { %v1033_v3 = vpop.eup %1032 }
 0x425   : > { %v538_v53 = vmul.f32 1.442695, %v536_v41  ;;  %v709_v54 = vmul.f32 1.442695, %v707_v45  ;;  %v546_v18 = vmul.f32 1.442695, %v544_v42  ;;  %v1035_v4 = vpop.eup %1034  ;;  %v526_v5 = vadd.f32 %v1033_v3, %v518_v13 }
 0x426   : > { %v717_v58 = vmul.f32 1.442695, %v715_v46  ;;  %v697_v15 = vadd.f32 %v1035_v4, %v689_v49 }
 0x427   : > { %1036 = vpow2.f32 %v538_v53 }
 0x428   : > { %1038 = vpow2.f32 %v516_v51  ;;  %v704_v21 = vpop.xlane.xlu2 %703  ;;  %v533_v63 = vpop.xlane.xlu0 %532 }
 0x429   : > { %1040 = vpow2.f32 %v709_v54  ;;  %v706_v1 = vmax.f32 %v1563_v11, %v704_v21  ;;  %v1589_v2 = vmax.f32 %v1568_v22, %v533_v63 }
 0x42a   : > { %1042 = vpow2.f32 %v546_v18 }
 0x42b   : > { %1044 = vpow2.f32 %v717_v58  ;;  %v708_v6 = vsub.f32 %v1563_v11, %v706_v1  ;;  %v716_v7 = vsub.f32 %v704_v21, %v706_v1  ;;  %v537_v8 = vsub.f32 %v1568_v22, %v1589_v2 }
 0x42c   : > { %1046 = vpow2.f32 %v695_v35  ;;  %v545_v34 = vsub.f32 %v533_v63, %v1589_v2  ;;  %v465_v11 = vadd.f32 %v1021_v47, %v1572_v27  ;;  %v690_v22 = vmul.f32 %v1031_v0, %v636_v9 }
 0x42d   : > { %v1037_v48 = vpop.eup %1036  ;;  %v711_v16 = vmul.f32 1.442695, %v708_v6  ;;  %v719_v33 = vmul.f32 1.442695, %v716_v7  ;;  %v540_v44 = vmul.f32 1.442695, %v537_v8 }
 0x42e   : > { %v1039_v12 = vpop.eup %1038  ;;  %v542_v14 = vmul.f32 %v1037_v48, %v526_v5  ;;  %v548_v26 = vmul.f32 1.442695, %v545_v34 }
 0x42f   : > { %v1041_v17 = vpop.eup %1040  ;;  %1048 = vpow2.f32 %v711_v16  ;;  %v519_v32 = vmul.f32 %v1039_v12, %v465_v11 }
 0x430   : > { %v1043_v23 = vpop.eup %1042  ;;  %v713_v24 = vmul.f32 %v1041_v17, %v697_v15  ;;  %1050 = vpow2.f32 %v524_v10 }
 0x431   : > { %v1045_v25 = vpop.eup %1044  ;;  %v550_v43 = vadd.f32 %v1043_v23, %v542_v14  ;;  %1052 = vpow2.f32 %v719_v33 }
 0x432   : > { %v721_v28 = vadd.f32 %v1045_v25, %v713_v24  ;;  %v1047_v31 = vpop.eup %1046  ;;  %1054 = vpow2.f32 %v540_v44 }
 0x433   : > { %v698_v20 = vadd.f32 %v1047_v31, %v690_v22 }
 0x434   : > { %1056 = vlog2.f32 %v721_v28 }
 0x435   : > { %1058 = vpow2.f32 %v548_v26  ;;  %v1049_v36 = vpop.eup %1048 }
 0x436   : > { %1060 = vlog2.f32 %v550_v43  ;;  %v1051_v37 = vpop.eup %1050  ;;  %v714_v30 = vmul.f32 %v1049_v36, %v698_v20 }
 0x437   : > { %v1053_v38 = vpop.eup %1052  ;;  %v527_v40 = vadd.f32 %v1051_v37, %v519_v32 }
 0x438   : > { %v1055_v27 = vpop.eup %1054  ;;  %v722_v41 = vadd.f32 %v1053_v38, %v714_v30 }
 0x439   : > { %v543_v45 = vmul.f32 %v1055_v27, %v527_v40 }
 0x43a   : > { %v1057_v42 = vpop.eup %1056  ;;  %1062 = vlog2.f32 %v722_v41 }
 0x43b   : > { %v1059_v46 = vpop.eup %1058  ;;  %v724_v50 = vmul.f32 0.6931472, %v1057_v42 }
 0x43c   : > { %v1061_v47 = vpop.eup %1060  ;;  %v551_v51 = vadd.f32 %v1059_v46, %v543_v45 }
 0x43d   : > { %v553_v52 = vmul.f32 0.6931472, %v1061_v47  ;;  %v727_v53 = vadd.f32 %v724_v50, %v1577_v39 }
 0x43e   : > { %1064 = vlog2.f32 %v551_v51 }
 0x43f   : > { %v556_v56 = vadd.f32 %v553_v52, %v1575_v29  ;;  %v729_v57 = vsub.f32 %v727_v53, %v1543_v60 }
 0x440   : > { %v1063_v54 = vpop.eup %1062 }
 0x441   : > { %v726_v55 = vmul.f32 0.6931472, %v1063_v54  ;;  %v558_v21 = vsub.f32 %v556_v56, %v1543_v60  ;;  %v731_v35 = vsel %vm560_vm0, %v729_v57, 0.0 }
 0x443   : > { %v728_v19 = vadd.f32 %v726_v55, %v706_v1  ;;  %v561_v29 = vsel %vm560_vm0, %v558_v21, 0.0 }
 0x444   : > { %v1065_v18 = vpop.eup %1064 }
 0x445   : > { %v555_v58 = vmul.f32 0.6931472, %v1065_v18  ;;  %v730_v61 = vsub.f32 %v728_v19, %v1541_v59 }
 0x447   : > { %v557_v13 = vadd.f32 %v555_v58, %v1589_v2  ;;  %v732_v62 = vsel %vm560_vm0, %v730_v61, 0.0 }
 0x448   : > { %v733_v39 = vadd.f32 %v732_v62, %v731_v35 }
 0x449   : > { %v559_v63 = vsub.f32 %v557_v13, %v1541_v59 }
 0x44a   : > { %734 = vadd.xlane.f32.xlu1 %v733_v39 }
 0x44b   : > { %v562_v0 = vsel %vm560_vm0, %v559_v63, 0.0 }
 0x44c   : > { %v563_v49 = vadd.f32 %v562_v0, %v561_v29 }
 0x44e   : > { %564 = vadd.xlane.f32.xlu0 %v563_v49 }
 0x4bd   : > { %v735_v1 = vpop.xlane.xlu1 %734 }
 0x4be   : > { %v736_v3 = vrot.slane %v735_v1, 4 }
 0x4c0   : > { %v737_v4 = vadd.f32 %v736_v3, %v735_v1 }
 0x4c1   : > { %v565_v5 = vpop.xlane.xlu0 %564 }
 0x4c2   : > { %v566_v2 = vrot.slane %v565_v5, 4  ;;  %v738_v6 = vrot.slane %v737_v4, 2 }
 0x4c4   : > { %v567_v60 = vadd.f32 %v566_v2, %v565_v5  ;;  %v739_v7 = vadd.f32 %v738_v6, %v737_v4 }
 0x4c6   : > { %v568_v8 = vrot.slane %v567_v60, 2  ;;  %v740_v48 = vrot.slane %v739_v7, 1 }
 0x4c8   : > { %v569_v9 = vadd.f32 %v568_v8, %v567_v60  ;;  %v741_v10 = vadd.f32 %v740_v48, %v739_v7 }
 0x4ca   : > { %v570_v59 = vrot.slane %v569_v9, 1 }
 0x4cc   : > { %v571_v34 = vadd.f32 %v570_v59, %v569_v9 }
 0x4ce   : > { %925 = vpush %v571_v34 }
 0x4cf   : > { %927 = vpush %v741_v10 }
 0x4ff   : > { %s926_s10 = spop %925 }
 0x500   : > { %s928_s13 = spop %927 }
 0x501   : > { %s743_s11 = sadd.f32 %s928_s13, %s926_s10  ;;  %751 = sbr.rel (%p912_p1) target bundleno = 1356 (0x54c), region = 60 }
 0x503   : > { %s745_s6 = sadd.f32 %s744_s9, %s743_s11 }
 0x505   : > { %747 = sst [smem:[#allocation2]] %s745_s6 }
 0x506   : > { %v1259_v12 = vmov 32.0   ;;  %s752_s7 = sld [smem:[#allocation2]] }
 0x507   : > { %1066 = vrcp.f32 %v1259_v12 }
 0x50d   : > { %v1067_v14 = vpop.eup %1066 }
 0x50e   : > { %v754_v15 = vmul.f32 32.0, %v1067_v14  ;;  %vm758_vm12 = vweird.f32 %v1067_v14 }
 0x510   : > { %v755_v16 = vsub.f32 1.0, %v754_v15 }
 0x512   : > { %v756_v33 = vmul.f32 %v1067_v14, %v755_v16 }
 0x514   : > { %v757_v17 = vadd.f32 %v1067_v14, %v756_v33 }
 0x516   : > { %v759_v44 = vsel %vm758_vm12, %v1067_v14, %v757_v17 }
 0x517   : > { %929 = vpush %v759_v44 }
 0x548   : > { %s930_s21 = spop %929 }
 0x549   : > { %s761_s22 = smul.f32 %s930_s21, %s752_s7 }
 0x54b   : > { %763 = sst [smem:[#allocation11]] %s761_s22 }
 0x54c PF: > { %p969_p4 = scmp.eq.s32.totalorder %s1305_s19, 1  ;;  %s770_s29 = sshll.u32 %s1627_s4, 4  ;;  %s771_s29 = int_to_ptr.hbm [resolvable:$true] %s770_s29 }
 0x54d   : > { %s1260_s14 = smov [#allocation11]  }
 0x54e   : > { %946 = dma.smem_to_hbm (%p969_p4), %s1260_s14, 16, %s771_s29, [#allocation5]  }
 0x54f   : > { %1235 = dma.done.wait (%p969_p4), [#allocation5], 16  }
 0x550   : > { %1237 = vsyncadd (%p969_p4), [#allocation5], 4294967280 }
 0x551   : > { %779 = sfence }
 0x552 PF: > { %p19_p5 = scmp.ge.s32.totalorder %s1338_s8, 4   ;;  %s1631_s15 = smov %s1244_s16 }
 0x553   : > { %s1632_s16 = smov %s1248_s17  ;;  %s1633_s17 = smov %s1349_s12 }
 0x554   : > { %s1634_s18 = smov %s1338_s8  ;;  %21 = sbr.rel (!%p19_p5) target bundleno = 7 (0x7), region = 105 }
 0x559   :  { %785 = vsyncpa [#allocation4], 1 }
 0x55a   :  { %787 = vsyncpa [#allocation4 + $0x1], 1 }
 0x55b   :  { %788 = vsyncpa [#allocation7], 1 }
 0x55c   :  { %790 = vsyncpa [#allocation7 + $0x1], 1 }
 0x55d   :  { %791 = vsyncpa [#allocation10], 1 }
 0x55e   :  { %792 = vsyncpa [#allocation5], 1 }
 0x55f   :  { %794 = vsyncpa [#allocation5 + $0x1], 1 }

</bundles_post_ra>
